<compile_context>
chip_gen: v7x
topology: tpu7x:2x2x1
jax: 0.10.0
libtpu: 0.0.40
codegen_flags: <defaults>
</compile_context>

<pallas_src>
import jax
import jax.numpy as jnp
from jax.experimental import pallas as pl
from jax.experimental.pallas import tpu as pltpu
import numpy as np


def make_rnn_kernel(num_layers, seq_len, batch, hidden_dim):
    """Builds a Pallas kernel running the stacked RNN + fc on VMEM-resident data."""
    T, B, H = seq_len, batch, hidden_dim

    def kernel(*refs):
        # refs layout:
        #   [0]            x_ref    (T*B, D_in)   time-major, flattened
        #   [1 .. 3*L]     per layer: wih_ref (D, H), whh_ref (H, H), bias_ref (1, H)
        #   [1+3L]         wfc_ref  (H, O)
        #   [2+3L]         bfc_ref  (1, O)
        #   [3+3L]         out_ref  (B, O)
        x_ref = refs[0]
        w_refs = refs[1:1 + 3 * num_layers]
        wfc_ref = refs[1 + 3 * num_layers]
        bfc_ref = refs[2 + 3 * num_layers]
        out_ref = refs[3 + 3 * num_layers]

        src = x_ref[...]                      # (T*B, D_in)
        h_last = None
        for l in range(num_layers):
            wih = w_refs[3 * l][...]          # (D_in or H, H)
            whh = w_refs[3 * l + 1][...]      # (H, H)
            bias = w_refs[3 * l + 2][...]     # (1, H)

            # Hoisted input projection: one big MXU matmul for the whole sequence,
            # off the serial dependence chain.
            xp = jnp.dot(src, wih, preferred_element_type=jnp.float32) + bias  # (T*B, H)

            h = jnp.zeros((B, H), jnp.float32)
            outs = []
            for t in range(T):                # fully unrolled recurrence (T static, small)
                h = jnp.tanh(
                    xp[t * B:(t + 1) * B, :]
                    + jnp.dot(h, whh, preferred_element_type=jnp.float32))
                outs.append(h)
            h_last = h

            if l + 1 < num_layers:
                # Next layer consumes the full sequence output, flattened time-major.
                src = jnp.concatenate(outs, axis=0)   # (T*B, H)

        # Final Linear on the last timestep's hidden state (== out[:, -1, :] @ W_fc^T + b_fc).
        out_ref[...] = (
            jnp.dot(h_last, wfc_ref[...], preferred_element_type=jnp.float32)
            + bfc_ref[...])

    return kernel


def rnn_model_forward(x, layer_params, fc_w_t, fc_b):
    """x: (B, T, D_in) batch-first, like the PyTorch module. Returns (B, O)."""
    B, T, D = x.shape
    H = layer_params[0][1].shape[0]
    O = fc_w_t.shape[1]
    num_layers = len(layer_params)

    # Time-major and flattened to (T*B, D) so the kernel's per-layer input projection
    # is a single 2-D matmul and per-timestep access is a static row slice.
    x_flat = jnp.transpose(x, (1, 0, 2)).reshape(T * B, D)

    flat = []
    for (wih_t, whh_t, b) in layer_params:
        flat.extend([wih_t, whh_t, b])

    kernel = make_rnn_kernel(num_layers, T, B, H)
    n_inputs = 1 + 3 * num_layers + 2

    # Everything fits comfortably in VMEM at these shapes; grid-less call.
    # (For large B, add a parallel batch grid axis + BlockSpec tiling to use both
    #  v7x TensorCores and keep per-step VMEM bounded.)
    return pl.pallas_call(
        kernel,
        out_shape=jax.ShapeDtypeStruct((B, O), jnp.float32),
        in_specs=[pl.BlockSpec(memory_space=pltpu.MemorySpace.VMEM)] * n_inputs,
        out_specs=pl.BlockSpec(memory_space=pltpu.MemorySpace.VMEM),
    )(x_flat, *flat, fc_w_t, fc_b)


def rnn_model_reference(x, layer_params, fc_w_t, fc_b):
    """Pure-JAX reference matching nn.RNN(batch_first=True) + nn.Linear (eval mode)."""
    B, T, _ = x.shape
    H = layer_params[0][1].shape[0]
    seq = x
    for (wih_t, whh_t, b) in layer_params:
        h = jnp.zeros((B, H), jnp.float32)
        outs = []
        for t in range(T):
            h = jnp.tanh(seq[:, t, :] @ wih_t + h @ whh_t + b)
            outs.append(h)
        seq = jnp.stack(outs, axis=1)
    return seq[:, -1, :] @ fc_w_t + fc_b


if __name__ == "__main__":
    # Small shapes consistent with the module.
    input_dim, hidden_dim, layer_dim, output_dim = 16, 32, 2, 4
    dropout_prob = 0.0  # eval semantics; dropout not applied (see TODO above)
    B, T = 2, 8

    key = jax.random.PRNGKey(0)
    k_x, key = jax.random.split(key)
    x = jax.random.normal(k_x, (B, T, input_dim), dtype=jnp.float32)

    # Deterministic parameter init (uniform(-1/sqrt(H), 1/sqrt(H)), like PyTorch).
    bound = 1.0 / np.sqrt(hidden_dim)
    layer_params = []
    for l in range(layer_dim):
        d_in = input_dim if l == 0 else hidden_dim
        k1, k2, k3, k4, key = jax.random.split(key, 5)
        w_ih = jax.random.uniform(k1, (hidden_dim, d_in), jnp.float32, -bound, bound)
        w_hh = jax.random.uniform(k2, (hidden_dim, hidden_dim), jnp.float32, -bound, bound)
        b_ih = jax.random.uniform(k3, (hidden_dim,), jnp.float32, -bound, bound)
        b_hh = jax.random.uniform(k4, (hidden_dim,), jnp.float32, -bound, bound)
        # Pre-transpose for x @ W^T form; combine the two biases.
        layer_params.append((w_ih.T, w_hh.T, (b_ih + b_hh).reshape(1, hidden_dim)))

    k5, k6, key = jax.random.split(key, 3)
    fc_w = jax.random.uniform(k5, (output_dim, hidden_dim), jnp.float32, -bound, bound)
    fc_b = jax.random.uniform(k6, (output_dim,), jnp.float32, -bound, bound)
    fc_w_t = fc_w.T
    fc_b2d = fc_b.reshape(1, output_dim)

    out = rnn_model_forward(x, layer_params, fc_w_t, fc_b2d)
    out = jax.block_until_ready(out)

    ref = rnn_model_reference(x, layer_params, fc_w_t, fc_b2d)
    np.testing.assert_allclose(np.asarray(out), np.asarray(ref), rtol=1e-5, atol=1e-5)
    assert out.shape == (B, output_dim)

    print("KERNEL_OK")
</pallas_src>

<mosaic_0001>
module attributes {stable_mosaic.version = 11 : i64} {
  func.func @kernel(%arg0: memref<16x16xf32, #tpu.memory_space<vmem>>, %arg1: memref<16x32xf32, #tpu.memory_space<vmem>>, %arg2: memref<32x32xf32, #tpu.memory_space<vmem>>, %arg3: memref<1x32xf32, #tpu.memory_space<vmem>>, %arg4: memref<32x32xf32, #tpu.memory_space<vmem>>, %arg5: memref<32x32xf32, #tpu.memory_space<vmem>>, %arg6: memref<1x32xf32, #tpu.memory_space<vmem>>, %arg7: memref<32x4xf32, #tpu.memory_space<vmem>>, %arg8: memref<1x4xf32, #tpu.memory_space<vmem>>, %arg9: memref<2x4xf32, #tpu.memory_space<vmem>>) attributes {dimension_semantics = [], scalar_prefetch = 0 : i64, scratch_operands = 0 : i64, tpu.core_type = #tpu.core_type<tc>} {
    %c0 = arith.constant 0 : index
    %c0_0 = arith.constant 0 : index
    %0 = vector.load %arg0[%c0, %c0_0] : memref<16x16xf32, #tpu.memory_space<vmem>>, vector<16x16xf32>
    %c0_1 = arith.constant 0 : index
    %c0_2 = arith.constant 0 : index
    %1 = vector.load %arg1[%c0_1, %c0_2] : memref<16x32xf32, #tpu.memory_space<vmem>>, vector<16x32xf32>
    %c0_3 = arith.constant 0 : index
    %c0_4 = arith.constant 0 : index
    %2 = vector.load %arg2[%c0_3, %c0_4] : memref<32x32xf32, #tpu.memory_space<vmem>>, vector<32x32xf32>
    %c0_5 = arith.constant 0 : index
    %c0_6 = arith.constant 0 : index
    %3 = vector.load %arg3[%c0_5, %c0_6] : memref<1x32xf32, #tpu.memory_space<vmem>>, vector<1x32xf32>
    %cst = arith.constant dense<0.000000e+00> : vector<16x32xf32>
    %4 = tpu.matmul %0, %1, %cst {dimension_numbers = #tpu.dot_dimension_numbers<[1], [0], [0], [1], [0, 0, 1, 1], [], []>} : vector<16x16xf32>, vector<16x32xf32>, vector<16x32xf32> -> vector<16x32xf32>
    %5 = vector.broadcast %3 : vector<1x32xf32> to vector<16x32xf32>
    %6 = arith.addf %4, %5 : vector<16x32xf32>
    %cst_7 = arith.constant 0.000000e+00 : f32
    %7 = vector.broadcast %cst_7 : f32 to vector<2x32xf32>
    %8 = vector.extract_strided_slice %6 {offsets = [0, 0], sizes = [2, 32], strides = [1, 1]} : vector<16x32xf32> to vector<2x32xf32>
    %cst_8 = arith.constant dense<0.000000e+00> : vector<2x32xf32>
    %9 = tpu.matmul %7, %2, %cst_8 {dimension_numbers = #tpu.dot_dimension_numbers<[1], [0], [0], [1], [0, 0, 1, 1], [], []>} : vector<2x32xf32>, vector<32x32xf32>, vector<2x32xf32> -> vector<2x32xf32>
    %10 = arith.addf %8, %9 : vector<2x32xf32>
    %11 = math.tanh %10 : vector<2x32xf32>
    %12 = vector.extract_strided_slice %6 {offsets = [2, 0], sizes = [2, 32], strides = [1, 1]} : vector<16x32xf32> to vector<2x32xf32>
    %cst_9 = arith.constant dense<0.000000e+00> : vector<2x32xf32>
    %13 = tpu.matmul %11, %2, %cst_9 {dimension_numbers = #tpu.dot_dimension_numbers<[1], [0], [0], [1], [0, 0, 1, 1], [], []>} : vector<2x32xf32>, vector<32x32xf32>, vector<2x32xf32> -> vector<2x32xf32>
    %14 = arith.addf %12, %13 : vector<2x32xf32>
    %15 = math.tanh %14 : vector<2x32xf32>
    %16 = vector.extract_strided_slice %6 {offsets = [4, 0], sizes = [2, 32], strides = [1, 1]} : vector<16x32xf32> to vector<2x32xf32>
    %cst_10 = arith.constant dense<0.000000e+00> : vector<2x32xf32>
    %17 = tpu.matmul %15, %2, %cst_10 {dimension_numbers = #tpu.dot_dimension_numbers<[1], [0], [0], [1], [0, 0, 1, 1], [], []>} : vector<2x32xf32>, vector<32x32xf32>, vector<2x32xf32> -> vector<2x32xf32>
    %18 = arith.addf %16, %17 : vector<2x32xf32>
    %19 = math.tanh %18 : vector<2x32xf32>
    %20 = vector.extract_strided_slice %6 {offsets = [6, 0], sizes = [2, 32], strides = [1, 1]} : vector<16x32xf32> to vector<2x32xf32>
    %cst_11 = arith.constant dense<0.000000e+00> : vector<2x32xf32>
    %21 = tpu.matmul %19, %2, %cst_11 {dimension_numbers = #tpu.dot_dimension_numbers<[1], [0], [0], [1], [0, 0, 1, 1], [], []>} : vector<2x32xf32>, vector<32x32xf32>, vector<2x32xf32> -> vector<2x32xf32>
    %22 = arith.addf %20, %21 : vector<2x32xf32>
    %23 = math.tanh %22 : vector<2x32xf32>
    %24 = vector.extract_strided_slice %6 {offsets = [8, 0], sizes = [2, 32], strides = [1, 1]} : vector<16x32xf32> to vector<2x32xf32>
    %cst_12 = arith.constant dense<0.000000e+00> : vector<2x32xf32>
    %25 = tpu.matmul %23, %2, %cst_12 {dimension_numbers = #tpu.dot_dimension_numbers<[1], [0], [0], [1], [0, 0, 1, 1], [], []>} : vector<2x32xf32>, vector<32x32xf32>, vector<2x32xf32> -> vector<2x32xf32>
    %26 = arith.addf %24, %25 : vector<2x32xf32>
    %27 = math.tanh %26 : vector<2x32xf32>
    %28 = vector.extract_strided_slice %6 {offsets = [10, 0], sizes = [2, 32], strides = [1, 1]} : vector<16x32xf32> to vector<2x32xf32>
    %cst_13 = arith.constant dense<0.000000e+00> : vector<2x32xf32>
    %29 = tpu.matmul %27, %2, %cst_13 {dimension_numbers = #tpu.dot_dimension_numbers<[1], [0], [0], [1], [0, 0, 1, 1], [], []>} : vector<2x32xf32>, vector<32x32xf32>, vector<2x32xf32> -> vector<2x32xf32>
    %30 = arith.addf %28, %29 : vector<2x32xf32>
    %31 = math.tanh %30 : vector<2x32xf32>
    %32 = vector.extract_strided_slice %6 {offsets = [12, 0], sizes = [2, 32], strides = [1, 1]} : vector<16x32xf32> to vector<2x32xf32>
    %cst_14 = arith.constant dense<0.000000e+00> : vector<2x32xf32>
    %33 = tpu.matmul %31, %2, %cst_14 {dimension_numbers = #tpu.dot_dimension_numbers<[1], [0], [0], [1], [0, 0, 1, 1], [], []>} : vector<2x32xf32>, vector<32x32xf32>, vector<2x32xf32> -> vector<2x32xf32>
    %34 = arith.addf %32, %33 : vector<2x32xf32>
    %35 = math.tanh %34 : vector<2x32xf32>
    %36 = vector.extract_strided_slice %6 {offsets = [14, 0], sizes = [2, 32], strides = [1, 1]} : vector<16x32xf32> to vector<2x32xf32>
    %cst_15 = arith.constant dense<0.000000e+00> : vector<2x32xf32>
    %37 = tpu.matmul %35, %2, %cst_15 {dimension_numbers = #tpu.dot_dimension_numbers<[1], [0], [0], [1], [0, 0, 1, 1], [], []>} : vector<2x32xf32>, vector<32x32xf32>, vector<2x32xf32> -> vector<2x32xf32>
    %38 = arith.addf %36, %37 : vector<2x32xf32>
    %39 = math.tanh %38 : vector<2x32xf32>
    %40 = tpu.concatenate %11, %15, %19, %23, %27, %31, %35, %39 in 0 : vector<2x32xf32>, vector<2x32xf32>, vector<2x32xf32>, vector<2x32xf32>, vector<2x32xf32>, vector<2x32xf32>, vector<2x32xf32>, vector<2x32xf32> -> vector<16x32xf32>
    %c0_16 = arith.constant 0 : index
    %c0_17 = arith.constant 0 : index
    %41 = vector.load %arg4[%c0_16, %c0_17] : memref<32x32xf32, #tpu.memory_space<vmem>>, vector<32x32xf32>
    %c0_18 = arith.constant 0 : index
    %c0_19 = arith.constant 0 : index
    %42 = vector.load %arg5[%c0_18, %c0_19] : memref<32x32xf32, #tpu.memory_space<vmem>>, vector<32x32xf32>
    %c0_20 = arith.constant 0 : index
    %c0_21 = arith.constant 0 : index
    %43 = vector.load %arg6[%c0_20, %c0_21] : memref<1x32xf32, #tpu.memory_space<vmem>>, vector<1x32xf32>
    %cst_22 = arith.constant dense<0.000000e+00> : vector<16x32xf32>
    %44 = tpu.matmul %40, %41, %cst_22 {dimension_numbers = #tpu.dot_dimension_numbers<[1], [0], [0], [1], [0, 0, 1, 1], [], []>} : vector<16x32xf32>, vector<32x32xf32>, vector<16x32xf32> -> vector<16x32xf32>
    %45 = vector.broadcast %43 : vector<1x32xf32> to vector<16x32xf32>
    %46 = arith.addf %44, %45 : vector<16x32xf32>
    %cst_23 = arith.constant 0.000000e+00 : f32
    %47 = vector.broadcast %cst_23 : f32 to vector<2x32xf32>
    %48 = vector.extract_strided_slice %46 {offsets = [0, 0], sizes = [2, 32], strides = [1, 1]} : vector<16x32xf32> to vector<2x32xf32>
    %cst_24 = arith.constant dense<0.000000e+00> : vector<2x32xf32>
    %49 = tpu.matmul %47, %42, %cst_24 {dimension_numbers = #tpu.dot_dimension_numbers<[1], [0], [0], [1], [0, 0, 1, 1], [], []>} : vector<2x32xf32>, vector<32x32xf32>, vector<2x32xf32> -> vector<2x32xf32>
    %50 = arith.addf %48, %49 : vector<2x32xf32>
    %51 = math.tanh %50 : vector<2x32xf32>
    %52 = vector.extract_strided_slice %46 {offsets = [2, 0], sizes = [2, 32], strides = [1, 1]} : vector<16x32xf32> to vector<2x32xf32>
    %cst_25 = arith.constant dense<0.000000e+00> : vector<2x32xf32>
    %53 = tpu.matmul %51, %42, %cst_25 {dimension_numbers = #tpu.dot_dimension_numbers<[1], [0], [0], [1], [0, 0, 1, 1], [], []>} : vector<2x32xf32>, vector<32x32xf32>, vector<2x32xf32> -> vector<2x32xf32>
    %54 = arith.addf %52, %53 : vector<2x32xf32>
    %55 = math.tanh %54 : vector<2x32xf32>
    %56 = vector.extract_strided_slice %46 {offsets = [4, 0], sizes = [2, 32], strides = [1, 1]} : vector<16x32xf32> to vector<2x32xf32>
    %cst_26 = arith.constant dense<0.000000e+00> : vector<2x32xf32>
    %57 = tpu.matmul %55, %42, %cst_26 {dimension_numbers = #tpu.dot_dimension_numbers<[1], [0], [0], [1], [0, 0, 1, 1], [], []>} : vector<2x32xf32>, vector<32x32xf32>, vector<2x32xf32> -> vector<2x32xf32>
    %58 = arith.addf %56, %57 : vector<2x32xf32>
    %59 = math.tanh %58 : vector<2x32xf32>
    %60 = vector.extract_strided_slice %46 {offsets = [6, 0], sizes = [2, 32], strides = [1, 1]} : vector<16x32xf32> to vector<2x32xf32>
    %cst_27 = arith.constant dense<0.000000e+00> : vector<2x32xf32>
    %61 = tpu.matmul %59, %42, %cst_27 {dimension_numbers = #tpu.dot_dimension_numbers<[1], [0], [0], [1], [0, 0, 1, 1], [], []>} : vector<2x32xf32>, vector<32x32xf32>, vector<2x32xf32> -> vector<2x32xf32>
    %62 = arith.addf %60, %61 : vector<2x32xf32>
    %63 = math.tanh %62 : vector<2x32xf32>
    %64 = vector.extract_strided_slice %46 {offsets = [8, 0], sizes = [2, 32], strides = [1, 1]} : vector<16x32xf32> to vector<2x32xf32>
    %cst_28 = arith.constant dense<0.000000e+00> : vector<2x32xf32>
    %65 = tpu.matmul %63, %42, %cst_28 {dimension_numbers = #tpu.dot_dimension_numbers<[1], [0], [0], [1], [0, 0, 1, 1], [], []>} : vector<2x32xf32>, vector<32x32xf32>, vector<2x32xf32> -> vector<2x32xf32>
    %66 = arith.addf %64, %65 : vector<2x32xf32>
    %67 = math.tanh %66 : vector<2x32xf32>
    %68 = vector.extract_strided_slice %46 {offsets = [10, 0], sizes = [2, 32], strides = [1, 1]} : vector<16x32xf32> to vector<2x32xf32>
    %cst_29 = arith.constant dense<0.000000e+00> : vector<2x32xf32>
    %69 = tpu.matmul %67, %42, %cst_29 {dimension_numbers = #tpu.dot_dimension_numbers<[1], [0], [0], [1], [0, 0, 1, 1], [], []>} : vector<2x32xf32>, vector<32x32xf32>, vector<2x32xf32> -> vector<2x32xf32>
    %70 = arith.addf %68, %69 : vector<2x32xf32>
    %71 = math.tanh %70 : vector<2x32xf32>
    %72 = vector.extract_strided_slice %46 {offsets = [12, 0], sizes = [2, 32], strides = [1, 1]} : vector<16x32xf32> to vector<2x32xf32>
    %cst_30 = arith.constant dense<0.000000e+00> : vector<2x32xf32>
    %73 = tpu.matmul %71, %42, %cst_30 {dimension_numbers = #tpu.dot_dimension_numbers<[1], [0], [0], [1], [0, 0, 1, 1], [], []>} : vector<2x32xf32>, vector<32x32xf32>, vector<2x32xf32> -> vector<2x32xf32>
    %74 = arith.addf %72, %73 : vector<2x32xf32>
    %75 = math.tanh %74 : vector<2x32xf32>
    %76 = vector.extract_strided_slice %46 {offsets = [14, 0], sizes = [2, 32], strides = [1, 1]} : vector<16x32xf32> to vector<2x32xf32>
    %cst_31 = arith.constant dense<0.000000e+00> : vector<2x32xf32>
    %77 = tpu.matmul %75, %42, %cst_31 {dimension_numbers = #tpu.dot_dimension_numbers<[1], [0], [0], [1], [0, 0, 1, 1], [], []>} : vector<2x32xf32>, vector<32x32xf32>, vector<2x32xf32> -> vector<2x32xf32>
    %78 = arith.addf %76, %77 : vector<2x32xf32>
    %79 = math.tanh %78 : vector<2x32xf32>
    %c0_32 = arith.constant 0 : index
    %c0_33 = arith.constant 0 : index
    %80 = vector.load %arg7[%c0_32, %c0_33] : memref<32x4xf32, #tpu.memory_space<vmem>>, vector<32x4xf32>
    %cst_34 = arith.constant dense<0.000000e+00> : vector<2x4xf32>
    %81 = tpu.matmul %79, %80, %cst_34 {dimension_numbers = #tpu.dot_dimension_numbers<[1], [0], [0], [1], [0, 0, 1, 1], [], []>} : vector<2x32xf32>, vector<32x4xf32>, vector<2x4xf32> -> vector<2x4xf32>
    %c0_35 = arith.constant 0 : index
    %c0_36 = arith.constant 0 : index
    %82 = vector.load %arg8[%c0_35, %c0_36] : memref<1x4xf32, #tpu.memory_space<vmem>>, vector<1x4xf32>
    %83 = vector.broadcast %82 : vector<1x4xf32> to vector<2x4xf32>
    %84 = arith.addf %81, %83 : vector<2x4xf32>
    %c0_37 = arith.constant 0 : index
    %c0_38 = arith.constant 0 : index
    %85 = vector.load %arg9[%c0_37, %c0_38] : memref<2x4xf32, #tpu.memory_space<vmem>>, vector<2x4xf32>
    tpu.vector_store %arg9[%c0_37, %c0_38], %84 {strides = array<i32>} : memref<2x4xf32, #tpu.memory_space<vmem>>, vector<2x4xf32>,
    return
  }
}

</mosaic_0001>

<bundles_post_ra>
// kernel: tpu_custom_call.1
= control target key start
LH: loop header
LB: loop body
LE: loop exit
PB: predicated region body
PF: predicated region fallthrough
CT: control target
= control target key end

     0   :  { %14 = vsyncpa [#allocation3], 0  ;;  %s2560_s0 = inlined_call_operand.hbm [shape: f32[16,16], index: 0, kind: input, shape index: {}]   ;;  %s2561_s1 = inlined_call_operand.hbm [shape: f32[16,32], index: 1, kind: input, shape index: {}]   ;;  %s2562_s2 = inlined_call_operand.vmem [shape: f32[32,32], index: 2, kind: input, shape index: {}]   ;;  %s2563_s3 = inlined_call_operand.vmem [shape: f32[1,32], index: 3, kind: input, shape index: {}]   ;;  %s2564_s4 = inlined_call_operand.hbm [shape: f32[32,32], index: 4, kind: input, shape index: {}]   ;;  %s2565_s5 = inlined_call_operand.hbm [shape: f32[32,32], index: 5, kind: input, shape index: {}]   ;;  %s2566_s6 = inlined_call_operand.vmem [shape: f32[1,32], index: 6, kind: input, shape index: {}]   ;;  %s2567_s7 = inlined_call_operand.vmem [shape: f32[32,4], index: 7, kind: input, shape index: {}]   ;;  %s2568_s8 = inlined_call_operand.vmem [shape: f32[1,4], index: 8, kind: input, shape index: {}]   ;;  %s2569_s9 = inlined_call_operand.hbm [shape: f32[2,4], index: 9, kind: output, shape index: {}]  }
   0x1   :  { %15 = vsyncpa [#allocation6], 0 }
   0x2   :  { %16 = vsyncpa [#allocation9], 0 }
   0x3   :  { %17 = vsyncpa [#allocation4], 0  ;;  %s2234_s30 = smov [#allocation5]   ;;  %s2235_s11 = smov [#allocation2]  }
   0x4   :  { %s35_s10 = sshll.u32 %s2234_s30, 4  ;;  %s23_s12 = sshll.u32 %s2235_s11, 4  ;;  %s36_s10 = int_to_ptr.vmem [resolvable:$true] %s35_s10  ;;  %s2294_s12 = int_to_ptr.vmem [resolvable:$true] %s23_s12 }
   0x5   :  { %s2116_s15 = scalar_lea.hbm %s2561_s1, 256 }
   0x6   :  { %p2117_p0 = scmp.ne.s32.totalorder %s2561_s1, %s2116_s15  ;;  %p2120_p1 = scmp.lt.u32.totalorder %s2116_s15, %s2561_s1 }
   0x8   :  { %p2122_p2 = pnand %p2120_p1, %p2117_p0 }
   0xa   :  { %2125 = shalt.err (!%p2122_p2)
}
   0xb   :  { %s2126_s20 = scalar_lea.vmem %s36_s10, 256  ;;  %p2131_p4 = scmp.lt.s32.totalorder %s36_s10, %s36_s10 }
   0xc   :  { %p2127_p3 = scmp.ne.s32.totalorder %s36_s10, %s2126_s20  ;;  %p2132_p5 = scmp.lt.s32.totalorder %s2126_s20, %s2126_s20 }
   0xe   :  { %p2133_p6 = por %p2132_p5, %p2131_p4 }
  0x10   :  { %p2134_p7 = pnand %p2133_p6, %p2127_p3 }
  0x12   :  { %2137 = shalt.err (!%p2134_p7)
}
  0x13   :  { %s2236_s21 = smov 128   ;;  %s2237_s22 = smov 8  }
  0x14   :  { %41 = dma.hbm_to_vmem [thread:$0]  %s2561_s1, 256, %s36_s10, [#allocation6], %s2236_s21, %s2236_s21, %s2237_s22  }
  0x15   :  { %s2138_s27 = scalar_lea.hbm %s2560_s0, 256 }
  0x16   :  { %p2139_p8 = scmp.ne.s32.totalorder %s2560_s0, %s2138_s27  ;;  %p2142_p9 = scmp.lt.u32.totalorder %s2138_s27, %s2560_s0 }
  0x18   :  { %p2144_p10 = pnand %p2142_p9, %p2139_p8 }
  0x1a   :  { %2147 = shalt.err (!%p2144_p10)
}
  0x1b   :  { %s2148_s13 = scalar_lea.vmem %s2294_s12, 256  ;;  %p2153_p12 = scmp.lt.s32.totalorder %s2294_s12, %s2294_s12 }
  0x1c   :  { %p2149_p11 = scmp.ne.s32.totalorder %s2294_s12, %s2148_s13  ;;  %p2154_p13 = scmp.lt.s32.totalorder %s2148_s13, %s2148_s13 }
  0x1e   :  { %p2155_p0 = por %p2154_p13, %p2153_p12 }
  0x20   :  { %p2156_p1 = pnand %p2155_p0, %p2149_p11 }
  0x22   :  { %2159 = shalt.err (!%p2156_p1)
}
  0x23   :  { %29 = dma.hbm_to_vmem [thread:$0]  %s2560_s0, 256, %s2294_s12, [#allocation3], %s2236_s21, %s2236_s21, %s2237_s22  }
  0x24   :  { %s2238_s14 = smov [#allocation7]   ;;  %s2239_s16 = smov [#allocation8]  }
  0x25   :  { %s51_s15 = sshll.u32 %s2238_s14, 4  ;;  %s63_s17 = sshll.u32 %s2239_s16, 4  ;;  %s52_s15 = int_to_ptr.vmem [resolvable:$true] %s51_s15  ;;  %s2331_s17 = int_to_ptr.vmem [resolvable:$true] %s63_s17 }
  0x26   :  { %s2160_s20 = scalar_lea.hbm %s2564_s4, 512 }
  0x27   :  { %p2161_p2 = scmp.ne.s32.totalorder %s2564_s4, %s2160_s20  ;;  %p2164_p3 = scmp.lt.u32.totalorder %s2160_s20, %s2564_s4 }
  0x29   :  { %p2166_p4 = pnand %p2164_p3, %p2161_p2 }
  0x2b   :  { %2169 = shalt.err (!%p2166_p4)
}
  0x2c   :  { %s2170_s0 = scalar_lea.vmem %s52_s15, 512  ;;  %p2175_p6 = scmp.lt.s32.totalorder %s52_s15, %s52_s15 }
  0x2d   :  { %p2171_p5 = scmp.ne.s32.totalorder %s52_s15, %s2170_s0  ;;  %p2176_p7 = scmp.lt.s32.totalorder %s2170_s0, %s2170_s0 }
  0x2f   :  { %p2177_p8 = por %p2176_p7, %p2175_p6 }
  0x31   :  { %p2178_p9 = pnand %p2177_p8, %p2171_p5 }
  0x33   :  { %2181 = shalt.err (!%p2178_p9)
}
  0x34   :  { %57 = dma.hbm_to_vmem [thread:$0]  %s2564_s4, 512, %s52_s15, [#allocation6], %s2236_s21, %s2236_s21, %s2237_s22  }
  0x35   :  { %s2182_s30 = scalar_lea.hbm %s2565_s5, 512 }
  0x36   :  { %p2183_p10 = scmp.ne.s32.totalorder %s2565_s5, %s2182_s30  ;;  %p2186_p11 = scmp.lt.u32.totalorder %s2182_s30, %s2565_s5 }
  0x38   :  { %p2188_p12 = pnand %p2186_p11, %p2183_p10 }
  0x3a   :  { %2191 = shalt.err (!%p2188_p12)
}
  0x3b   :  { %s2192_s14 = scalar_lea.vmem %s2331_s17, 512  ;;  %p2197_p0 = scmp.lt.s32.totalorder %s2331_s17, %s2331_s17 }
  0x3c   :  { %p2193_p13 = scmp.ne.s32.totalorder %s2331_s17, %s2192_s14  ;;  %p2198_p1 = scmp.lt.s32.totalorder %s2192_s14, %s2192_s14 }
  0x3e   :  { %p2199_p2 = por %p2198_p1, %p2197_p0 }
  0x40   :  { %p2200_p3 = pnand %p2199_p2, %p2193_p13 }
  0x42   :  { %2203 = shalt.err (!%p2200_p3)
}
  0x43   :  { %69 = dma.hbm_to_vmem [thread:$0]  %s2565_s5, 512, %s2331_s17, [#allocation9], %s2236_s21, %s2236_s21, %s2237_s22  }
  0x44   :  { %2226 = dma.done.wait [#allocation3], 256  }
  0x45   :  { %2227 = vsyncadd [#allocation3], 4294967040 }
  0x46   :  { %2228 = dma.done.wait [#allocation6], 768  }
  0x47   :  { %2229 = vsyncadd [#allocation6], 4294966528 }
  0x48   :  { %2230 = dma.done.wait [#allocation9], 512  }
  0x49   :  { %2231 = vsyncadd [#allocation9], 4294966784  ;;  %v2240_v0 = vmov 0.0|0.0   ;;  %vm2241_vm0 = vmmov 0   ;;  %v2242_v1 = vmov 0.0   ;;  %vm103_vm1 = vcmask 130048  }
  0x4a   :  { %1964 = vmatprep.subr.bf16.mxu1 %v2240_v0  ;;  %1770 = vmatprep.mubr.msk.f32.mxu1 %vm2241_vm0, %v2242_v1  ;;  %v90_v2 = vld [vmem:[#allocation5] sm:$0xff]  ;;  %v91_v3 = vld [vmem:[#allocation5 + $0x8] sm:$0xff]  ;;  %v92_v4 = vld [vmem:[%s2562_s2] sm:$0xff]  ;;  %vm185_vm2 = vcmask 261120   ;;  %vm809_vm3 = vcmask 1041408   ;;  %vm811_vm4 = vcmask 1043456  }
  0x4b   :  { %v1960_v5 = vpack.c.bf16 %v91_v3, %v90_v2  ;;  %v93_v6 = vld [vmem:[%s2562_s2 + $0x8] sm:$0xff]  ;;  %v88_v7 = vld [vmem:[#allocation2] sm:$0xff]  ;;  %v94_v9 = vld [vmem:[%s2562_s2 + $0x10] sm:$0xff]  ;;  %vm813_vm5 = vcmask 1045504   ;;  %s2243_s13 = smov [#allocation10]   ;;  %vm1619_vm6 = vcmask 25600  }
  0x4c   :  { %v2377_v8 = vpack.c.bf16 %v93_v6, %v92_v4  ;;  %1759 = vmatprep.mubr.msk.f32.mxu0 %vm103_vm1, %v88_v7  ;;  %v95_v10 = vld [vmem:[%s2562_s2 + $0x18] sm:$0xff]  ;;  %v89_v11 = vld [vmem:[#allocation2 + $0x8] sm:$0xff]  ;;  %v1638_v13 = vld [vmem:[%s2563_s3] ss:$0 sm:$0xff]  ;;  %s1627_s1 = sshll.u32 %s2243_s13, 4  ;;  %s1628_s1 = int_to_ptr.vmem [resolvable:$true] %s1627_s1 }
  0x4d   :  { %1961 = vmatprep.subr.bf16.mxu0 %v1960_v5  ;;  %v2387_v12 = vpack.c.bf16 %v95_v10, %v94_v9  ;;  %v818_v61 = vld [vmem:[#allocation7] sm:$0xff]  ;;  %v819_v62 = vld [vmem:[#allocation7 + $0x8] sm:$0xff]  ;;  %v820_v4 = vld [vmem:[#allocation7 + $0x10] sm:$0xff]  ;;  %p2209_p5 = scmp.lt.s32.totalorder %s1628_s1, %s1628_s1 }
  0x4e   :  { %1966 = vmatpush3.bf16.msra.mxu1 %v2377_v8  ;;  %1963 = vmatpush3.bf16.msra.mxu0 %v1960_v5  ;;  %v822_v63 = vld [vmem:[#allocation8] sm:$0xff]  ;;  %v2012_v2 = vpack.c.bf16 %v819_v62, %v818_v61  ;;  %v823_v3 = vld [vmem:[#allocation8 + $0x8] sm:$0xff]  ;;  %v821_v5 = vld [vmem:[#allocation7 + $0x18] sm:$0xff] }
  0x4f   :  { %1967 = vmatprep.subr.bf16.mxu1 %v2240_v0  ;;  %1970 = vmatprep.subr.bf16.mxu0 %v2240_v0  ;;  %v2459_v6 = vpack.c.bf16 %v823_v3, %v822_v63  ;;  %v2016_v7 = vpack.c.bf16 %v821_v5, %v820_v4  ;;  %v825_v9 = vld [vmem:[#allocation8 + $0x18] sm:$0xff]  ;;  %v1535_v61 = vld [vmem:[%s2567_s7 + $0x8] sm:$0xff] }
  0x50   :  { %v1537_v63 = vld [vmem:[%s2567_s7 + $0x18] sm:$0xff] }
  0x51   :  { %1760 = vmatmul.mubr.msk.f32.vlgmr.msra.gmra.mrb[0].mxu0 %vm103_vm1, %v89_v11 }
  0x52   :  { %1969 = vmatpush3.bf16.msra.mxu1 %v2387_v12  ;;  %1972 = vmatpush3.bf16.msra.mxu0 %v2377_v8 }
  0x53   :  { %1973 = vmatprep.subr.bf16.mxu0 %v2240_v0  ;;  %1781 = vmatprep.mubr.msk.f32.mxu0 %vm2241_vm0, %v2242_v1 }
  0x54   :  { %1976 = vmatprep.subr.bf16.mxu1 %v2240_v0 }
  0x55   :  { %1771 = vmatmul.mubr.f32.vlgmr.msra.gmra.mrb[0].mxu1 %v2242_v1 }
  0x56   :  { %1975 = vmatpush3.bf16.msra.mxu0 %v2387_v12  ;;  %1978 = vmatpush3.bf16.msra.mxu1 %v2377_v8 }
  0x57   :  { %1979 = vmatprep.subr.bf16.mxu1 %v2240_v0  ;;  %1792 = vmatprep.mubr.msk.f32.mxu1 %vm2241_vm0, %v2242_v1 }
  0x58   :  { %1982 = vmatprep.subr.bf16.mxu0 %v2240_v0 }
  0x5a   :  { %1981 = vmatpush3.bf16.msra.mxu1 %v2387_v12 }
  0x5b   :  { %1988 = vmatprep.subr.bf16.mxu1 %v2240_v0 }
 0x124   :  { %v1761_v14 = vpop.f32.mrb[0].mxu0 }
 0x125   :  { %v2410_v15 = vadd.f32 %v1761_v14, %v1638_v13  ;;  %v176_v16 = vpop.f32.mrb[1].mxu0 }
 0x126   :  { %v177_v17 = vadd.f32 %v1638_v13, %v176_v16 }
 0x128   :  { %v255_v18 = vpop.f32.mrb[0].mxu1 }
 0x129   :  { %v259_v19 = vadd.f32 %v255_v18, %v177_v17  ;;  %v1772_v20 = vpop.f32.mrb[1].mxu1 }
 0x12b   :  { %2084 = vtanh.f32 %v259_v19 }
 0x135   :  { %v2085_v21 = vpop.eup %2084 }
 0x136   :  { %1782 = vmatmul.mubr.msk.f32.vlgmr.msra.gmra.mrb[2].mxu0 %vm185_vm2, %v2085_v21 }
 0x137   :  { %1984 = vmatpush3.bf16.msra.mxu0 %v2377_v8  ;;  %1803 = vmatprep.mubr.msk.f32.mxu0 %vm2241_vm0, %v2242_v1 }
 0x138   :  { %1985 = vmatprep.subr.bf16.mxu0 %v2240_v0 }
 0x13b   :  { %1987 = vmatpush3.bf16.msra.mxu0 %v2387_v12 }
 0x13c   :  { %1994 = vmatprep.subr.bf16.mxu0 %v2240_v0 }
 0x209   :  { %v330_v22 = vpop.f32.mrb[2].mxu0 }
 0x20a   :  { %v335_v23 = vrot.slane %v330_v22, 6  ;;  %v1783_v24 = vpop.f32.mrb[3].mxu0 }
 0x20c   :  { %v337_v25 = vadd.f32 %v335_v23, %v177_v17 }
 0x20e   :  { %2086 = vtanh.f32 %v337_v25 }
 0x218   :  { %v2087_v26 = vpop.eup %2086 }
 0x219   :  { %v340_v27 = vrot.slane %v2087_v26, 2  ;;  %v810_v33 = vsel %vm809_vm3, %v2085_v21, %v2087_v26 }
 0x21b   :  { %1793 = vmatmul.mubr.msk.f32.vlgmr.msra.gmra.mrb[2].mxu1 %vm185_vm2, %v340_v27 }
 0x21c   :  { %1990 = vmatpush3.bf16.msra.mxu1 %v2377_v8  ;;  %1814 = vmatprep.mubr.msk.f32.mxu1 %vm2241_vm0, %v2242_v1 }
 0x21d   :  { %1991 = vmatprep.subr.bf16.mxu1 %v2240_v0 }
 0x220   :  { %1993 = vmatpush3.bf16.msra.mxu1 %v2387_v12 }
 0x221   :  { %2000 = vmatprep.subr.bf16.mxu1 %v2240_v0 }
 0x2ee   :  { %v409_v28 = vpop.f32.mrb[2].mxu1 }
 0x2ef   :  { %v414_v29 = vrot.slane %v409_v28, 4  ;;  %v1794_v30 = vpop.f32.mrb[3].mxu1 }
 0x2f1   :  { %v416_v31 = vadd.f32 %v414_v29, %v177_v17 }
 0x2f3   :  { %2088 = vtanh.f32 %v416_v31 }
 0x2fd   :  { %v2089_v32 = vpop.eup %2088 }
 0x2fe   :  { %v419_v34 = vrot.slane %v2089_v32, 4  ;;  %v812_v35 = vsel %vm811_vm4, %v810_v33, %v2089_v32 }
 0x300   :  { %1804 = vmatmul.mubr.msk.f32.vlgmr.msra.gmra.mrb[4].mxu0 %vm185_vm2, %v419_v34 }
 0x301   :  { %1996 = vmatpush3.bf16.msra.mxu0 %v2377_v8  ;;  %1825 = vmatprep.mubr.msk.f32.mxu0 %vm2241_vm0, %v2242_v1 }
 0x302   :  { %1997 = vmatprep.subr.bf16.mxu0 %v2240_v0 }
 0x305   :  { %1999 = vmatpush3.bf16.msra.mxu0 %v2387_v12 }
 0x306   :  { %2006 = vmatprep.subr.bf16.mxu0 %v2240_v0 }
 0x3d3   :  { %v488_v36 = vpop.f32.mrb[4].mxu0 }
 0x3d4   :  { %v493_v37 = vrot.slane %v488_v36, 2  ;;  %v1805_v38 = vpop.f32.mrb[5].mxu0 }
 0x3d6   :  { %v495_v39 = vadd.f32 %v493_v37, %v177_v17 }
 0x3d8   :  { %2090 = vtanh.f32 %v495_v39 }
 0x3e2   :  { %v2091_v40 = vpop.eup %2090 }
 0x3e3   :  { %v498_v41 = vrot.slane %v2091_v40, 6  ;;  %v814_v42 = vsel %vm813_vm5, %v812_v35, %v2091_v40 }
 0x3e5   :  { %1815 = vmatmul.mubr.msk.f32.vlgmr.msra.gmra.mrb[4].mxu1 %vm185_vm2, %v498_v41 }
 0x3e6   :  { %2002 = vmatpush3.bf16.msra.mxu1 %v2377_v8  ;;  %1836 = vmatprep.mubr.msk.f32.mxu1 %vm2241_vm0, %v2242_v1 }
 0x3e7   :  { %2003 = vmatprep.subr.bf16.mxu1 %v2240_v0 }
 0x3ea   :  { %2005 = vmatpush3.bf16.msra.mxu1 %v2387_v12 }
 0x3eb   :  { %2013 = vmatprep.subr.bf16.mxu1 %v2012_v2 }
 0x4b8   :  { %v567_v43 = vpop.f32.mrb[4].mxu1 }
 0x4b9   :  { %v571_v44 = vadd.f32 %v567_v43, %v2410_v15  ;;  %v1816_v45 = vpop.f32.mrb[5].mxu1 }
 0x4bb   :  { %2092 = vtanh.f32 %v571_v44 }
 0x4c5   :  { %v2093_v46 = vpop.eup %2092 }
 0x4c6   :  { %1826 = vmatmul.mubr.msk.f32.vlgmr.msra.gmra.mrb[6].mxu0 %vm185_vm2, %v2093_v46 }
 0x4c7   :  { %2008 = vmatpush3.bf16.msra.mxu0 %v2377_v8  ;;  %1847 = vmatprep.mubr.msk.f32.mxu0 %vm2241_vm0, %v2242_v1  ;;  %v824_v8 = vld [vmem:[#allocation8 + $0x10] sm:$0xff] }
 0x4c8   :  { %2009 = vmatprep.subr.bf16.mxu0 %v2240_v0  ;;  %v2462_v10 = vpack.c.bf16 %v825_v9, %v824_v8 }
 0x4cb   :  { %2011 = vmatpush3.bf16.msra.mxu0 %v2387_v12 }
 0x4cc   :  { %2020 = vmatprep.subr.bf16.mxu0 %v2240_v0 }
 0x599   :  { %v642_v47 = vpop.f32.mrb[6].mxu0 }
 0x59a   :  { %v647_v48 = vrot.slane %v642_v47, 6  ;;  %v1827_v49 = vpop.f32.mrb[7].mxu0 }
 0x59c   :  { %v649_v50 = vadd.f32 %v647_v48, %v2410_v15 }
 0x59e   :  { %2094 = vtanh.f32 %v649_v50 }
 0x5a8   :  { %v2095_v51 = vpop.eup %2094 }
 0x5a9   :  { %v652_v52 = vrot.slane %v2095_v51, 2  ;;  %v815_v58 = vsel %vm809_vm3, %v2093_v46, %v2095_v51 }
 0x5ab   :  { %1837 = vmatmul.mubr.msk.f32.vlgmr.msra.gmra.mrb[6].mxu1 %vm185_vm2, %v652_v52 }
 0x5ac   :  { %1858 = vmatprep.mubr.msk.f32.mxu1 %vm185_vm2, %v814_v42  ;;  %2015 = vmatpush3.bf16.msra.mxu1 %v2012_v2 }
 0x5ad   :  { %2017 = vmatprep.subr.bf16.mxu1 %v2016_v7 }
 0x5b0   :  { %2019 = vmatpush3.bf16.msra.mxu1 %v2016_v7 }
 0x5b1   :  { %2026 = vmatprep.subr.bf16.mxu1 %v2240_v0 }
 0x67e   :  { %v721_v53 = vpop.f32.mrb[6].mxu1 }
 0x67f   :  { %v726_v54 = vrot.slane %v721_v53, 4  ;;  %v1838_v55 = vpop.f32.mrb[7].mxu1 }
 0x681   :  { %v728_v56 = vadd.f32 %v726_v54, %v2410_v15 }
 0x683   :  { %2096 = vtanh.f32 %v728_v56 }
 0x68d   :  { %v2097_v57 = vpop.eup %2096 }
 0x68e   :  { %v731_v59 = vrot.slane %v2097_v57, 4  ;;  %v816_v60 = vsel %vm811_vm4, %v815_v58, %v2097_v57 }
 0x690   :  { %1848 = vmatmul.mubr.msk.f32.vlgmr.msra.gmra.mrb[8].mxu0 %vm185_vm2, %v731_v59 }
 0x691   :  { %1869 = vmatprep.mubr.msk.f32.mxu0 %vm2241_vm0, %v2242_v1  ;;  %2022 = vmatpush3.bf16.msra.mxu0 %v2459_v6 }
 0x692   :  { %2023 = vmatprep.subr.bf16.mxu0 %v2240_v0 }
 0x695   :  { %2025 = vmatpush3.bf16.msra.mxu0 %v2462_v10 }
 0x696   :  { %2032 = vmatprep.subr.bf16.mxu0 %v2240_v0 }
 0x698   :  { %1870 = vmatmul.mubr.f32.vlgmr.msra.gmra.mrb[10].mxu0 %v2242_v1 }
 0x699   :  { %2034 = vmatpush3.bf16.msra.mxu0 %v2459_v6  ;;  %1891 = vmatprep.mubr.msk.f32.mxu0 %vm2241_vm0, %v2242_v1 }
 0x69a   :  { %2035 = vmatprep.subr.bf16.mxu0 %v2240_v0 }
 0x69d   :  { %2037 = vmatpush3.bf16.msra.mxu0 %v2462_v10 }
 0x69e   :  { %2044 = vmatprep.subr.bf16.mxu0 %v2240_v0 }
 0x763   :  { %v800_v11 = vpop.f32.mrb[8].mxu0 }
 0x764   :  { %v805_v12 = vrot.slane %v800_v11, 2  ;;  %v1849_v13 = vpop.f32.mrb[9].mxu0 }
 0x766   :  { %v807_v14 = vadd.f32 %v805_v12, %v2410_v15  ;;  %v1648_v15 = vld [vmem:[%s2566_s6] ss:$0 sm:$0xff] }
 0x768   :  { %2098 = vtanh.f32 %v807_v14 }
 0x76b   :  { %v980_v18 = vpop.f32.mrb[10].mxu0 }
 0x76c   :  { %v1871_v19 = vpop.f32.mrb[11].mxu0 }
 0x772   :  { %v2099_v16 = vpop.eup %2098 }
 0x773   :  { %v817_v17 = vsel %vm813_vm5, %v816_v60, %v2099_v16  ;;  %v1534_v60 = vld [vmem:[%s2567_s7] sm:$0xff] }
 0x774   :  { %1859 = vmatmul.mubr.msk.f32.vlgmr.msra.gmra.mrb[8].mxu1 %vm185_vm2, %v817_v17  ;;  %v2069_v62 = vpack.c.bf16 %v1535_v61, %v1534_v60 }
 0x775   :  { %2028 = vmatpush3.bf16.msra.mxu1 %v2459_v6  ;;  %1880 = vmatprep.mubr.msk.f32.mxu1 %vm2241_vm0, %v2242_v1 }
 0x776   :  { %2029 = vmatprep.subr.bf16.mxu1 %v2240_v0 }
 0x779   :  { %2031 = vmatpush3.bf16.msra.mxu1 %v2462_v10 }
 0x77a   :  { %2038 = vmatprep.subr.bf16.mxu1 %v2240_v0 }
 0x847   :  { %v1860_v20 = vpop.f32.mrb[8].mxu1 }
 0x848   :  { %v2487_v21 = vadd.f32 %v1860_v20, %v1648_v15  ;;  %v905_v22 = vpop.f32.mrb[9].mxu1 }
 0x849   :  { %v906_v23 = vadd.f32 %v1648_v15, %v905_v22 }
 0x84b   :  { %v984_v24 = vadd.f32 %v980_v18, %v906_v23 }
 0x84d   :  { %2100 = vtanh.f32 %v984_v24 }
 0x857   :  { %v2101_v25 = vpop.eup %2100 }
 0x858   :  { %1881 = vmatmul.mubr.msk.f32.vlgmr.msra.gmra.mrb[10].mxu1 %vm185_vm2, %v2101_v25 }
 0x859   :  { %2040 = vmatpush3.bf16.msra.mxu1 %v2459_v6  ;;  %1902 = vmatprep.mubr.msk.f32.mxu1 %vm2241_vm0, %v2242_v1 }
 0x85a   :  { %2041 = vmatprep.subr.bf16.mxu1 %v2240_v0 }
 0x85d   :  { %2043 = vmatpush3.bf16.msra.mxu1 %v2462_v10 }
 0x85e   :  { %2050 = vmatprep.subr.bf16.mxu1 %v2240_v0 }
 0x92b   :  { %v1055_v26 = vpop.f32.mrb[10].mxu1 }
 0x92c   :  { %v1060_v27 = vrot.slane %v1055_v26, 6  ;;  %v1882_v28 = vpop.f32.mrb[11].mxu1 }
 0x92e   :  { %v1062_v29 = vadd.f32 %v1060_v27, %v906_v23 }
 0x930   :  { %2102 = vtanh.f32 %v1062_v29 }
 0x93a   :  { %v2103_v30 = vpop.eup %2102 }
 0x93b   :  { %v1065_v31 = vrot.slane %v2103_v30, 2 }
 0x93d   :  { %1892 = vmatmul.mubr.msk.f32.vlgmr.msra.gmra.mrb[12].mxu0 %vm185_vm2, %v1065_v31 }
 0x93e   :  { %2046 = vmatpush3.bf16.msra.mxu0 %v2459_v6  ;;  %1913 = vmatprep.mubr.msk.f32.mxu0 %vm2241_vm0, %v2242_v1 }
 0x93f   :  { %2047 = vmatprep.subr.bf16.mxu0 %v2240_v0 }
 0x942   :  { %2049 = vmatpush3.bf16.msra.mxu0 %v2462_v10 }
 0x943   :  { %2056 = vmatprep.subr.bf16.mxu0 %v2240_v0 }
 0xa10   :  { %v1134_v32 = vpop.f32.mrb[12].mxu0 }
 0xa11   :  { %v1139_v33 = vrot.slane %v1134_v32, 4  ;;  %v1893_v34 = vpop.f32.mrb[13].mxu0 }
 0xa13   :  { %v1141_v35 = vadd.f32 %v1139_v33, %v906_v23 }
 0xa15   :  { %2104 = vtanh.f32 %v1141_v35 }
 0xa1f   :  { %v2105_v36 = vpop.eup %2104 }
 0xa20   :  { %v1144_v37 = vrot.slane %v2105_v36, 4 }
 0xa22   :  { %1903 = vmatmul.mubr.msk.f32.vlgmr.msra.gmra.mrb[12].mxu1 %vm185_vm2, %v1144_v37 }
 0xa23   :  { %2052 = vmatpush3.bf16.msra.mxu1 %v2459_v6  ;;  %1924 = vmatprep.mubr.msk.f32.mxu1 %vm2241_vm0, %v2242_v1 }
 0xa24   :  { %2053 = vmatprep.subr.bf16.mxu1 %v2240_v0 }
 0xa27   :  { %2055 = vmatpush3.bf16.msra.mxu1 %v2462_v10 }
 0xa28   :  { %2062 = vmatprep.subr.bf16.mxu1 %v2240_v0 }
 0xaf5   :  { %v1213_v38 = vpop.f32.mrb[12].mxu1 }
 0xaf6   :  { %v1218_v39 = vrot.slane %v1213_v38, 2  ;;  %v1904_v40 = vpop.f32.mrb[13].mxu1 }
 0xaf8   :  { %v1220_v41 = vadd.f32 %v1218_v39, %v906_v23 }
 0xafa   :  { %2106 = vtanh.f32 %v1220_v41 }
 0xb04   :  { %v2107_v42 = vpop.eup %2106 }
 0xb05   :  { %v1223_v43 = vrot.slane %v2107_v42, 6 }
 0xb07   :  { %1914 = vmatmul.mubr.msk.f32.vlgmr.msra.gmra.mrb[14].mxu0 %vm185_vm2, %v1223_v43 }
 0xb08   :  { %2058 = vmatpush3.bf16.msra.mxu0 %v2459_v6  ;;  %1935 = vmatprep.mubr.msk.f32.mxu0 %vm2241_vm0, %v2242_v1 }
 0xb09   :  { %2059 = vmatprep.subr.bf16.mxu0 %v2240_v0 }
 0xb0c   :  { %2061 = vmatpush3.bf16.msra.mxu0 %v2462_v10 }
 0xb0d   :  { %2068 = vmatprep.subr.bf16.mxu0 %v2240_v0 }
 0xbda   :  { %v1292_v44 = vpop.f32.mrb[14].mxu0 }
 0xbdb   :  { %v1296_v45 = vadd.f32 %v1292_v44, %v2487_v21  ;;  %v1915_v46 = vpop.f32.mrb[15].mxu0 }
 0xbdd   :  { %2108 = vtanh.f32 %v1296_v45 }
 0xbe7   :  { %v2109_v47 = vpop.eup %2108 }
 0xbe8   :  { %1925 = vmatmul.mubr.msk.f32.vlgmr.msra.gmra.mrb[14].mxu1 %vm185_vm2, %v2109_v47 }
 0xbe9   :  { %2064 = vmatpush3.bf16.msra.mxu1 %v2459_v6  ;;  %1946 = vmatprep.mubr.msk.f32.mxu1 %vm2241_vm0, %v2242_v1 }
 0xbea   :  { %2065 = vmatprep.subr.bf16.mxu1 %v2240_v0 }
 0xbed   :  { %2067 = vmatpush3.bf16.msra.mxu1 %v2462_v10 }
 0xcbb   :  { %v1367_v48 = vpop.f32.mrb[14].mxu1 }
 0xcbc   :  { %v1372_v49 = vrot.slane %v1367_v48, 6  ;;  %v1926_v50 = vpop.f32.mrb[15].mxu1 }
 0xcbe   :  { %v1374_v51 = vadd.f32 %v1372_v49, %v2487_v21 }
 0xcc0   :  { %2110 = vtanh.f32 %v1374_v51 }
 0xcca   :  { %v2111_v52 = vpop.eup %2110 }
 0xccb   :  { %v1377_v53 = vrot.slane %v2111_v52, 2 }
 0xccd   :  { %1936 = vmatmul.mubr.msk.f32.vlgmr.msra.gmra.mrb[16].mxu0 %vm185_vm2, %v1377_v53 }
 0xcce   :  { %1957 = vmatprep.mubr.msk.f32.mxu0 %vm2241_vm0, %v2242_v1  ;;  %2070 = vmatpush3.bf16.msra.mxu0 %v2069_v62  ;;  %v1536_v1 = vld [vmem:[%s2567_s7 + $0x10] sm:$0xff]  ;;  %s2204_s7 = scalar_lea.vmem %s1628_s1, 32 }
 0xccf   :  { %2071 = vmatprep.subr.bf16.mxu0 %v2240_v0  ;;  %v2072_v2 = vpack.c.bf16 %v1537_v63, %v1536_v1  ;;  %v1658_v0 = vld [vmem:[%s2568_s8] ss:$0 sm:$0xff]  ;;  %p2205_p4 = scmp.ne.s32.totalorder %s1628_s1, %s2204_s7  ;;  %p2210_p6 = scmp.lt.s32.totalorder %s2204_s7, %s2204_s7 }
 0xcd1   :  { %p2211_p7 = por %p2210_p6, %p2209_p5 }
 0xcd2   :  { %2073 = vmatpush3.bf16.msra.mxu0 %v2072_v2 }
 0xcd3   :  { %p2212_p8 = pnand %p2211_p7, %p2205_p4 }
 0xda0   :  { %v1446_v54 = vpop.f32.mrb[16].mxu0 }
 0xda1   :  { %v1451_v55 = vrot.slane %v1446_v54, 4  ;;  %v1937_v56 = vpop.f32.mrb[17].mxu0 }
 0xda3   :  { %v1453_v57 = vadd.f32 %v1451_v55, %v2487_v21 }
 0xda5   :  { %2112 = vtanh.f32 %v1453_v57 }
 0xdaf   :  { %v2113_v58 = vpop.eup %2112 }
 0xdb0   :  { %v1456_v59 = vrot.slane %v2113_v58, 4 }
 0xdb2   :  { %1947 = vmatmul.mubr.msk.f32.vlgmr.msra.gmra.mrb[16].mxu1 %vm185_vm2, %v1456_v59 }
 0xe85   :  { %v1525_v3 = vpop.f32.mrb[16].mxu1 }
 0xe86   :  { %v1530_v4 = vrot.slane %v1525_v3, 2  ;;  %v1948_v5 = vpop.f32.mrb[17].mxu1 }
 0xe88   :  { %v1532_v6 = vadd.f32 %v1530_v4, %v2487_v21 }
 0xe8a   :  { %2114 = vtanh.f32 %v1532_v6 }
 0xe94   :  { %v2115_v7 = vpop.eup %2114 }
 0xe95   :  { %v1546_v8 = vrot.slane %v2115_v7, 6 }
 0xe97   :  { %1958 = vmatmul.mubr.msk.f32.vlgmr.msra.gmra.mrb[18].mxu0 %vm185_vm2, %v1546_v8 }
 0xf6a   :  { %v1615_v9 = vpop.f32.mrb[18].mxu0 }
 0xf6b   :  { %v1616_v10 = vadd.f32 %v1658_v0, %v1615_v9  ;;  %v1959_v11 = vpop.f32.mrb[19].mxu0 }
 0xf6d   :  { %1620 = vst.msk [vmem:[#allocation10] sm:$0x3] %vm1619_vm6, %v1616_v10 }
 0xf6e   :  { %2215 = shalt.err (!%p2212_p8)
}
 0xf6f   :  { %s2216_s4 = scalar_lea.hbm %s2569_s9, 32 }
 0xf70   :  { %p2217_p9 = scmp.ne.s32.totalorder %s2569_s9, %s2216_s4  ;;  %p2220_p10 = scmp.lt.u32.totalorder %s2216_s4, %s2569_s9 }
 0xf72   :  { %p2222_p11 = pnand %p2220_p10, %p2217_p9 }
 0xf74   :  { %2225 = shalt.err (!%p2222_p11)
}
 0xf75   :  { %1630 = dma.vmem_to_hbm [thread:$0]  %s1628_s1, 32, %s2569_s9, [#allocation4]  }
 0xf76   :  { %2232 = dma.done.wait [#allocation4], 32  }
 0xf77   :  { %2233 = vsyncadd [#allocation4], 4294967264 }
 0xf78   :  { %1634 = vsyncpa [#allocation3], 1 }
 0xf79   :  { %1635 = vsyncpa [#allocation6], 1 }
 0xf7a   :  { %1636 = vsyncpa [#allocation9], 1 }
 0xf7b   :  { %1637 = vsyncpa [#allocation4], 1 }

</bundles_post_ra>
